<compile_context>
chip_gen: v7x
topology: tpu7x:2x2x1
jax: 0.10.0
libtpu: 0.0.40
codegen_flags: <defaults>
</compile_context>

<pallas_src>
import functools

import jax
import jax.numpy as jnp
from jax import lax
from jax.experimental import pallas as pl
from jax.experimental.pallas import tpu as pltpu

ALPHA = 0.5
BETA = 1.0
SMOOTH = 1.0

_LANE = 128
_NCORES = 2  # leading "parallel" grid axis (v7x megacore split)


def _tversky_partial_kernel(x_ref, t_ref, o_ref, acc_xt, acc_x, acc_t, *, rows):
    """Accumulate partial sums of x*t, x and t over row blocks of (rows,128)."""
    j = pl.program_id(1)

    @pl.when(j == 0)
    def _():
        acc_xt[...] = jnp.zeros_like(acc_xt)
        acc_x[...] = jnp.zeros_like(acc_x)
        acc_t[...] = jnp.zeros_like(acc_t)

    br = x_ref.shape[0]
    # Global (unclamped) block id.  Rows past `rows` (partial edge block, or a
    # duplicated clamped block of an otherwise idle grid step) are masked to 0.
    blk = pl.program_id(0) * pl.num_programs(1) + j
    row_ids = lax.broadcasted_iota(jnp.int32, (br, _LANE), 0)
    valid = blk * br + row_ids < rows  # NOTE: int32 -> assumes n < 2**31 elems

    x = jnp.where(valid, x_ref[...].astype(jnp.float32), 0.0)
    t = jnp.where(valid, t_ref[...].astype(jnp.float32), 0.0)

    if br % 8 == 0:
        def fold(v):  # (br,128) -> (8,128): pure vreg adds on the VPU
            return jnp.sum(v.reshape(br // 8, 8, _LANE), axis=0)
    else:  # tiny-input fallback (br == rows < 8)
        def fold(v):
            return jnp.sum(v, axis=0, keepdims=True)

    acc_xt[...] += fold(x * t)
    acc_x[...] += fold(x)
    acc_t[...] += fold(t)

    @pl.when(j == pl.num_programs(1) - 1)
    def _():
        o_ref[...] = jnp.stack(
            [acc_xt[...], acc_x[...], acc_t[...]], axis=0).reshape(o_ref.shape)


def tversky_loss(inputs, targets, *, tversky_alpha=ALPHA, tversky_beta=BETA,
                 tversky_smooth=SMOOTH, block_rows=1024):
    """Pallas TPU implementation of TverskyLoss.forward."""
    x = inputs.reshape(-1)
    t = targets.reshape(-1)
    n = x.shape[0]

    rows = n // _LANE
    n_main = rows * _LANE

    # <128-element ragged tail handled with a handful of plain-JAX ops instead
    # of a full jnp.pad copy of both arrays.
    if n_main < n:
        x_tail = x[n_main:].astype(jnp.float32)
        t_tail = t[n_main:].astype(jnp.float32)
        tail = jnp.stack([jnp.sum(x_tail * t_tail),
                          jnp.sum(x_tail),
                          jnp.sum(t_tail)])
    else:
        tail = jnp.zeros((3,), jnp.float32)

    if rows > 0:
        x_main = x if n_main == n else x[:n_main]
        t_main = t if n_main == n else t[:n_main]
        x2 = x_main.reshape(rows, _LANE)  # free view: no padding copy
        t2 = t_main.reshape(rows, _LANE)

        assert block_rows % 8 == 0
        br = block_rows if rows >= block_rows else rows
        acc_rows = 8 if br % 8 == 0 else 1

        blocks_total = pl.cdiv(rows, br)
        bpc = pl.cdiv(blocks_total, _NCORES)  # blocks per core
        last_blk = blocks_total - 1

        def in_map(c, j):
            # Clamp so idle steps re-read the last block (fully masked in-kernel).
            return (jnp.minimum(c * bpc + j, last_blk), 0)

        kernel = functools.partial(_tversky_partial_kernel, rows=rows)

        partial = pl.pallas_call(
            kernel,
            out_shape=jax.ShapeDtypeStruct((_NCORES, 3, acc_rows, _LANE),
                                           jnp.float32),
            grid_spec=pltpu.PrefetchScalarGridSpec(
                num_scalar_prefetch=0,
                grid=(_NCORES, bpc),
                in_specs=[
                    pl.BlockSpec((br, _LANE), in_map),
                    pl.BlockSpec((br, _LANE), in_map),
                ],
                out_specs=pl.BlockSpec((1, 3, acc_rows, _LANE),
                                       lambda c, j: (c, 0, 0, 0)),
                scratch_shapes=[
                    pltpu.VMEM((acc_rows, _LANE), jnp.float32),  # sum(x*t)
                    pltpu.VMEM((acc_rows, _LANE), jnp.float32),  # sum(x)
                    pltpu.VMEM((acc_rows, _LANE), jnp.float32),  # sum(t)
                ],
            ),
            compiler_params=pltpu.CompilerParams(
                dimension_semantics=("parallel", "arbitrary")),
        )(x2, t2)
        sums = jnp.sum(partial, axis=(0, 2, 3)) + tail
    else:
        sums = tail

    tp = sums[0]
    fp = sums[1] - tp  # sum((1-t)*x) == sum(x) - sum(x*t)
    fn = sums[2] - tp  # sum(t*(1-x)) == sum(t) - sum(x*t)
    tversky = (tp + tversky_smooth) / (
        tp + tversky_alpha * fp + tversky_beta * fn + tversky_smooth)
    return 1.0 - tversky


def _tversky_ref(inputs, targets, alpha=ALPHA, beta=BETA, smooth=SMOOTH):
    x = inputs.reshape(-1).astype(jnp.float32)
    t = targets.reshape(-1).astype(jnp.float32)
    tp = jnp.sum(x * t)
    fp = jnp.sum((1.0 - t) * x)
    fn = jnp.sum(t * (1.0 - x))
    return 1.0 - (tp + smooth) / (tp + alpha * fp + beta * fn + smooth)


if __name__ == "__main__":
    key = jax.random.PRNGKey(0)
    k1, k2 = jax.random.split(key)
    # Synthetic segmentation-style inputs: probabilities and binary targets.
    x = jax.nn.sigmoid(jax.random.normal(k1, (2, 4, 16, 16), dtype=jnp.float32))
    y = (jax.random.uniform(k2, (2, 4, 16, 16)) > 0.5).astype(jnp.float32)

    loss = tversky_loss(x, y)
    loss = jax.block_until_ready(loss)

    ref = _tversky_ref(x, y)
    assert jnp.allclose(loss, ref, atol=1e-5, rtol=1e-5), (loss, ref)
    print("KERNEL_OK")
</pallas_src>

<mosaic_0001>
module attributes {stable_mosaic.version = 11 : i64} {
  func.func @_tversky_partial_kernel(%arg0: i32, %arg1: i32, %arg2: memref<16x128xf32, #tpu.memory_space<vmem>>, %arg3: memref<16x128xf32, #tpu.memory_space<vmem>>, %arg4: memref<1x3x8x128xf32, #tpu.memory_space<vmem>>, %arg5: memref<8x128xf32, #tpu.memory_space<vmem>>, %arg6: memref<8x128xf32, #tpu.memory_space<vmem>>, %arg7: memref<8x128xf32, #tpu.memory_space<vmem>>) attributes {dimension_semantics = [#tpu.dimension_semantics<parallel>, #tpu.dimension_semantics<arbitrary>], iteration_bounds = array<i64: 2, 1>, scalar_prefetch = 0 : i64, scratch_operands = 3 : i64, tpu.core_type = #tpu.core_type<tc>, window_params = [{transform_indices = @transform_0, window_bounds = array<i64: 16, 128>}, {transform_indices = @transform_1, window_bounds = array<i64: 16, 128>}, {transform_indices = @transform_2, window_bounds = array<i64: 1, 3, 8, 128>}]} {
    %c0_i32 = arith.constant 0 : i32
    %0 = arith.cmpi eq, %arg1, %c0_i32 : i32
    %1 = arith.extui %0 : i1 to i32
    %c0_i32_0 = arith.constant 0 : i32
    %2 = arith.cmpi ne, %1, %c0_i32_0 : i32
    scf.if %2 {
      %cst_23 = arith.constant 0.000000e+00 : f32
      %36 = vector.broadcast %cst_23 : f32 to vector<8x128xf32>
      %c0_24 = arith.constant 0 : index
      %c0_25 = arith.constant 0 : index
      %37 = vector.load %arg5[%c0_24, %c0_25] : memref<8x128xf32, #tpu.memory_space<vmem>>, vector<8x128xf32>
      tpu.vector_store %arg5[%c0_24, %c0_25], %36 {strides = array<i32>} : memref<8x128xf32, #tpu.memory_space<vmem>>, vector<8x128xf32>,
      %cst_26 = arith.constant 0.000000e+00 : f32
      %38 = vector.broadcast %cst_26 : f32 to vector<8x128xf32>
      %c0_27 = arith.constant 0 : index
      %c0_28 = arith.constant 0 : index
      %39 = vector.load %arg6[%c0_27, %c0_28] : memref<8x128xf32, #tpu.memory_space<vmem>>, vector<8x128xf32>
      tpu.vector_store %arg6[%c0_27, %c0_28], %38 {strides = array<i32>} : memref<8x128xf32, #tpu.memory_space<vmem>>, vector<8x128xf32>,
      %cst_29 = arith.constant 0.000000e+00 : f32
      %40 = vector.broadcast %cst_29 : f32 to vector<8x128xf32>
      %c0_30 = arith.constant 0 : index
      %c0_31 = arith.constant 0 : index
      %41 = vector.load %arg7[%c0_30, %c0_31] : memref<8x128xf32, #tpu.memory_space<vmem>>, vector<8x128xf32>
      tpu.vector_store %arg7[%c0_30, %c0_31], %40 {strides = array<i32>} : memref<8x128xf32, #tpu.memory_space<vmem>>, vector<8x128xf32>,
    } else {
    }
    %c1_i32 = arith.constant 1 : i32
    %3 = arith.muli %arg0, %c1_i32 : i32
    %4 = arith.addi %3, %arg1 : i32
    %5 = tpu.iota {dimensions = array<i32: 0>} : vector<16x128xi32>
    %c16_i32 = arith.constant 16 : i32
    %6 = arith.muli %4, %c16_i32 : i32
    %7 = vector.broadcast %6 : i32 to vector<16x128xi32>
    %8 = arith.addi %7, %5 : vector<16x128xi32>
    %c16_i32_1 = arith.constant 16 : i32
    %9 = vector.broadcast %c16_i32_1 : i32 to vector<16x128xi32>
    %10 = arith.cmpi slt, %8, %9 : vector<16x128xi32>
    %c0 = arith.constant 0 : index
    %c0_2 = arith.constant 0 : index
    %11 = vector.load %arg2[%c0, %c0_2] : memref<16x128xf32, #tpu.memory_space<vmem>>, vector<16x128xf32>
    %cst = arith.constant 0.000000e+00 : f32
    %12 = vector.broadcast %cst : f32 to vector<16x128xf32>
    %13 = arith.select %10, %11, %12 : vector<16x128xi1>, vector<16x128xf32>
    %c0_3 = arith.constant 0 : index
    %c0_4 = arith.constant 0 : index
    %14 = vector.load %arg3[%c0_3, %c0_4] : memref<16x128xf32, #tpu.memory_space<vmem>>, vector<16x128xf32>
    %cst_5 = arith.constant 0.000000e+00 : f32
    %15 = vector.broadcast %cst_5 : f32 to vector<16x128xf32>
    %16 = arith.select %10, %14, %15 : vector<16x128xi1>, vector<16x128xf32>
    %c0_6 = arith.constant 0 : index
    %c0_7 = arith.constant 0 : index
    %17 = vector.load %arg5[%c0_6, %c0_7] : memref<8x128xf32, #tpu.memory_space<vmem>>, vector<8x128xf32>
    %18 = arith.mulf %13, %16 : vector<16x128xf32>
    %19 = vector.shape_cast %18 : vector<16x128xf32> to vector<2x8x128xf32>
    %cst_8 = arith.constant dense<0.000000e+00> : vector<8x128xf32>
    %20 = vector.multi_reduction <add>, %19, %cst_8 [0] : vector<2x8x128xf32> to vector<8x128xf32>
    %21 = arith.addf %17, %20 : vector<8x128xf32>
    %c0_9 = arith.constant 0 : index
    %c0_10 = arith.constant 0 : index
    %22 = vector.load %arg5[%c0_9, %c0_10] : memref<8x128xf32, #tpu.memory_space<vmem>>, vector<8x128xf32>
    tpu.vector_store %arg5[%c0_9, %c0_10], %21 {strides = array<i32>} : memref<8x128xf32, #tpu.memory_space<vmem>>, vector<8x128xf32>,
    %c0_11 = arith.constant 0 : index
    %c0_12 = arith.constant 0 : index
    %23 = vector.load %arg6[%c0_11, %c0_12] : memref<8x128xf32, #tpu.memory_space<vmem>>, vector<8x128xf32>
    %24 = vector.shape_cast %13 : vector<16x128xf32> to vector<2x8x128xf32>
    %cst_13 = arith.constant dense<0.000000e+00> : vector<8x128xf32>
    %25 = vector.multi_reduction <add>, %24, %cst_13 [0] : vector<2x8x128xf32> to vector<8x128xf32>
    %26 = arith.addf %23, %25 : vector<8x128xf32>
    %c0_14 = arith.constant 0 : index
    %c0_15 = arith.constant 0 : index
    %27 = vector.load %arg6[%c0_14, %c0_15] : memref<8x128xf32, #tpu.memory_space<vmem>>, vector<8x128xf32>
    tpu.vector_store %arg6[%c0_14, %c0_15], %26 {strides = array<i32>} : memref<8x128xf32, #tpu.memory_space<vmem>>, vector<8x128xf32>,
    %c0_16 = arith.constant 0 : index
    %c0_17 = arith.constant 0 : index
    %28 = vector.load %arg7[%c0_16, %c0_17] : memref<8x128xf32, #tpu.memory_space<vmem>>, vector<8x128xf32>
    %29 = vector.shape_cast %16 : vector<16x128xf32> to vector<2x8x128xf32>
    %cst_18 = arith.constant dense<0.000000e+00> : vector<8x128xf32>
    %30 = vector.multi_reduction <add>, %29, %cst_18 [0] : vector<2x8x128xf32> to vector<8x128xf32>
    %31 = arith.addf %28, %30 : vector<8x128xf32>
    %c0_19 = arith.constant 0 : index
    %c0_20 = arith.constant 0 : index
    %32 = vector.load %arg7[%c0_19, %c0_20] : memref<8x128xf32, #tpu.memory_space<vmem>>, vector<8x128xf32>
    tpu.vector_store %arg7[%c0_19, %c0_20], %31 {strides = array<i32>} : memref<8x128xf32, #tpu.memory_space<vmem>>, vector<8x128xf32>,
    %c0_i32_21 = arith.constant 0 : i32
    %33 = arith.cmpi eq, %arg1, %c0_i32_21 : i32
    %34 = arith.extui %33 : i1 to i32
    %c0_i32_22 = arith.constant 0 : i32
    %35 = arith.cmpi ne, %34, %c0_i32_22 : i32
    scf.if %35 {
      %c0_23 = arith.constant 0 : index
      %c0_24 = arith.constant 0 : index
      %36 = vector.load %arg5[%c0_23, %c0_24] : memref<8x128xf32, #tpu.memory_space<vmem>>, vector<8x128xf32>
      %c0_25 = arith.constant 0 : index
      %c0_26 = arith.constant 0 : index
      %37 = vector.load %arg6[%c0_25, %c0_26] : memref<8x128xf32, #tpu.memory_space<vmem>>, vector<8x128xf32>
      %c0_27 = arith.constant 0 : index
      %c0_28 = arith.constant 0 : index
      %38 = vector.load %arg7[%c0_27, %c0_28] : memref<8x128xf32, #tpu.memory_space<vmem>>, vector<8x128xf32>
      %39 = vector.shape_cast %36 : vector<8x128xf32> to vector<1x8x128xf32>
      %40 = vector.shape_cast %37 : vector<8x128xf32> to vector<1x8x128xf32>
      %41 = vector.shape_cast %38 : vector<8x128xf32> to vector<1x8x128xf32>
      %42 = tpu.concatenate %39, %40, %41 in 0 : vector<1x8x128xf32>, vector<1x8x128xf32>, vector<1x8x128xf32> -> vector<3x8x128xf32>
      %43 = vector.shape_cast %42 : vector<3x8x128xf32> to vector<1x3x8x128xf32>
      %c0_29 = arith.constant 0 : index
      %c0_30 = arith.constant 0 : index
      %c0_31 = arith.constant 0 : index
      %c0_32 = arith.constant 0 : index
      %44 = vector.load %arg4[%c0_29, %c0_30, %c0_31, %c0_32] : memref<1x3x8x128xf32, #tpu.memory_space<vmem>>, vector<1x3x8x128xf32>
      tpu.vector_store %arg4[%c0_29, %c0_30, %c0_31, %c0_32], %43 {strides = array<i32>} : memref<1x3x8x128xf32, #tpu.memory_space<vmem>>, vector<1x3x8x128xf32>,
    } else {
    }
    return
  }
  func.func @transform_0(%arg0: i32, %arg1: i32) -> (i32, i32) {
    %c1_i32 = arith.constant 1 : i32
    %0 = arith.muli %arg0, %c1_i32 : i32
    %1 = arith.addi %0, %arg1 : i32
    %c0_i32 = arith.constant 0 : i32
    %2 = arith.minsi %1, %c0_i32 : i32
    %c0_i32_0 = arith.constant 0 : i32
    %c0_i32_1 = arith.constant 0 : i32
    return %2, %c0_i32_0 : i32, i32
  }
  func.func @transform_1(%arg0: i32, %arg1: i32) -> (i32, i32) {
    %c1_i32 = arith.constant 1 : i32
    %0 = arith.muli %arg0, %c1_i32 : i32
    %1 = arith.addi %0, %arg1 : i32
    %c0_i32 = arith.constant 0 : i32
    %2 = arith.minsi %1, %c0_i32 : i32
    %c0_i32_0 = arith.constant 0 : i32
    %c0_i32_1 = arith.constant 0 : i32
    return %2, %c0_i32_0 : i32, i32
  }
  func.func @transform_2(%arg0: i32, %arg1: i32) -> (i32, i32, i32, i32) {
    %c0_i32 = arith.constant 0 : i32
    %c0_i32_0 = arith.constant 0 : i32
    %c0_i32_1 = arith.constant 0 : i32
    %c0_i32_2 = arith.constant 0 : i32
    return %arg0, %c0_i32, %c0_i32_0, %c0_i32_1 : i32, i32, i32, i32
  }
}

</mosaic_0001>

<bundles_post_ra>
// kernel: tpu_custom_call.1
= control target key start
LH: loop header
LB: loop body
LE: loop exit
PB: predicated region body
PF: predicated region fallthrough
CT: control target
= control target key end

     0   :  { %7 = vsyncpa [#allocation6], 0  ;;  %s924_s0 = inlined_call_operand.hbm [shape: f32[16,128], index: 0, kind: input, shape index: {}]   ;;  %s925_s1 = inlined_call_operand.hbm [shape: f32[16,128], index: 1, kind: input, shape index: {}]   ;;  %s926_s2 = inlined_call_operand.hbm [shape: f32[2,3,8,128], index: 2, kind: output, shape index: {}]  }
   0x1   :  { %9 = vsyncpa [#allocation6 + $0x1], 0 }
   0x2   :  { %10 = vsyncpa [#allocation9], 0 }
   0x3   :  { %12 = vsyncpa [#allocation9 + $0x1], 0 }
   0x4   :  { %13 = vsyncpa [#allocation7], 0 }
   0x5   :  { %15 = vsyncpa [#allocation7 + $0x1], 0  ;;  %s713_s9 = smov 0   ;;  %s715_s10 = smov 0  }
   0x6   :  { %s717_s11 = smov 0   ;;  %s719_s12 = smov 0  }
   0x7   :  { %s721_s13 = smov 0   ;;  %s723_s14 = smov 0  }
   0x8   :  { %s725_s15 = smov 0   ;;  %s727_s16 = smov 0  }
   0x9 LB: > { %s406_s17 = sadd.s32 4294967295, %s689_s16   ;;  %s407_s18 = sadd.s32 4294967294, %s689_s16   ;;  %s689_s16 = sphi %s727_s16, %s21_s16   ;;  %s685_s15 = sphi %s725_s15, %s945_s15   ;;  %s681_s14 = sphi %s723_s14, %s944_s14   ;;  %s677_s13 = sphi %s721_s13, %s914_s13   ;;  %s673_s12 = sphi %s719_s12, %s943_s12   ;;  %s669_s11 = sphi %s717_s11, %s942_s11   ;;  %s665_s10 = sphi %s715_s10, %s941_s10   ;;  %s661_s9 = sphi %s713_s9, %s940_s9  }
   0xa   : > { %s33_s19 = sadd.s32 1, %s685_s15  ;;  %p658_p1 = scmp.ne.s32.totalorder %s677_s13, 0 }
   0xb   : > { %p35_p0 = scmp.ge.s32.totalorder %s33_s19, 2  ;;  %p54_p2 = scmp.eq.s32.totalorder %s689_s16, 0 }
   0xc   : > { %p59_p3 = scmp.ne.s32.totalorder %s677_s13, %s673_s12  ;;  %p60_p5 = scmp.eq.s32.totalorder %s406_s17, 0 }
   0xd   : > { %s947_s19 = smov (%p35_p0, %s33_s19), 0  ;;  %p759_p4 = por %p658_p1, %p54_p2 }
   0xe   : > { %p763_p6 = por %p60_p5, %p59_p3  ;;  %s101_s22 = ssub.s32 %s685_s15, %s947_s19 }
   0xf   : > { %p102_p7 = scmp.eq.s32.totalorder %s101_s22, 0  ;;  %s104_s23 = sadd.s32 1, %s669_s11 }
  0x10   : > { %s930_s21 = scalar_select %p763_p6, 1, 0 }
  0x11   : > { %s771_s24 = scalar_select %p102_p7, %s669_s11, %s104_s23  }
  0x12   : > { %p114_p8 = scmp.ne.s32.totalorder %s669_s11, %s665_s10  ;;  %p115_p9 = scmp.eq.s32.totalorder %s406_s17, 1 }
  0x13   : > { %p120_p10 = scmp.ne.s32.totalorder %s665_s10, %s661_s9  ;;  %p121_p11 = scmp.eq.s32.totalorder %s407_s18, 1 }
  0x14   : > { %p777_p12 = por %p115_p9, %p114_p8  ;;  %p444_p1 = scmp.lt.s32.totalorder %s689_s16, 2 }
  0x15   : > { %p782_p0 = por %p121_p11, %p120_p10  ;;  %s691_s27 = smov [#allocation5]  }
  0x16   : > { %s931_s25 = scalar_select %p777_p12, 1, 0 }
  0x17   : > { %s932_s26 = scalar_select %p782_p0, 1, 0 }
  0x18   : > { %s155_s28 = sshll.u32 %s691_s27, 4  ;;  %p789_p2 = pnand %p444_p1, %p759_p4  ;;  %s156_s28 = int_to_ptr.vmem [resolvable:$true] %s155_s28 }
  0x19   : > { %s522_s4 = scalar_lea.hbm %s924_s0, 256 }
  0x1a   : > { %p523_p3 = scmp.ne.s32.totalorder %s924_s0, %s522_s4  ;;  %p524_p5 = pneg %p789_p2 }
  0x1b   : > { %p529_p8 = scmp.lt.u32.totalorder %s522_s4, %s522_s4  ;;  %p531_p9 = scmp.lt.u32.totalorder %s522_s4, %s924_s0 }
  0x1c   : > { %p525_p7 = pnand %p524_p5, %p523_p3 }
  0x1d   : > { %p532_p10 = por %p531_p9, %p529_p8 }
  0x1e   : > { %p526_p4 = pneg %p525_p7 }
  0x20   : > { %p533_p11 = pnand %p532_p10, %p526_p4 }
  0x22   : > { %536 = shalt.err (!%p533_p11)
}
  0x23   : > { %s537_s12 = scalar_lea.vmem %s156_s28, 256  ;;  %s544_s17 = scalar_lea.vmem %s156_s28, 512 }
  0x24   : > { %p538_p1 = scmp.ne.s32.totalorder %s156_s28, %s537_s12  ;;  %p545_p12 = scmp.lt.s32.totalorder %s156_s28, %s156_s28 }
  0x25   : > { %p546_p6 = scmp.lt.s32.totalorder %s544_s17, %s537_s12 }
  0x26   : > { %p540_p13 = pnand %p538_p1, %p524_p5 }
  0x27   : > { %p547_p3 = por %p546_p6, %p545_p12 }
  0x28   : > { %p541_p0 = pneg %p540_p13 }
  0x2a   : > { %p548_p7 = pnand %p547_p3, %p541_p0 }
  0x2c   : > { %551 = shalt.err (!%p548_p7)
}
  0x2d   : > { %s692_s18 = smov 128   ;;  %s693_s20 = smov 8  }
  0x2e   : > { %436 = dma.hbm_to_vmem [thread:$0]  (!%p789_p2), %s924_s0, 256, %s156_s28, [#allocation6], %s692_s18, %s692_s18, %s693_s20  }
  0x2f   : > { %p416_p13 = scmp.ge.s32.totalorder %s689_s16, 1  ;;  %p187_p4 = scmp.lt.s32.totalorder %s689_s16, 3 }
  0x30   : > { %s694_s30 = smov [#allocation8]   ;;  %s552_s6 = scalar_lea.hbm %s925_s1, 256 }
  0x31   : > { %p820_p8 = pnand %p416_p13, %p187_p4  ;;  %s179_s3 = sshll.u32 %s694_s30, 4  ;;  %s180_s3 = int_to_ptr.vmem [resolvable:$true] %s179_s3 }
  0x32   : > { %p553_p6 = scmp.ne.s32.totalorder %s925_s1, %s552_s6  ;;  %p559_p9 = scmp.lt.u32.totalorder %s552_s6, %s552_s6 }
  0x33   : > { %s934_s27 = scalar_select %p820_p8, 1, 0 }
  0x34   : > { %p555_p12 = pnand %p553_p6, %p524_p5  ;;  %p561_p10 = scmp.lt.u32.totalorder %s552_s6, %s925_s1 }
  0x36   : > { %p556_p0 = pneg %p555_p12  ;;  %p562_p11 = por %p561_p10, %p559_p9 }
  0x38   : > { %p563_p1 = pnand %p562_p11, %p556_p0 }
  0x3a   : > { %566 = shalt.err (!%p563_p1)
}
  0x3b   : > { %s567_s17 = scalar_lea.vmem %s180_s3, 256  ;;  %s574_s22 = scalar_lea.vmem %s180_s3, 512 }
  0x3c   : > { %p568_p3 = scmp.ne.s32.totalorder %s180_s3, %s567_s17  ;;  %p575_p4 = scmp.lt.s32.totalorder %s180_s3, %s180_s3 }
  0x3d   : > { %p576_p8 = scmp.lt.s32.totalorder %s574_s22, %s567_s17 }
  0x3e   : > { %p570_p7 = pnand %p568_p3, %p524_p5 }
  0x3f   : > { %p577_p6 = por %p576_p8, %p575_p4 }
  0x40   : > { %p571_p13 = pneg %p570_p7 }
  0x42   : > { %p578_p12 = pnand %p577_p6, %p571_p13 }
  0x44   : > { %581 = shalt.err (!%p578_p12)
}
  0x45   : > { %439 = dma.hbm_to_vmem [thread:$0]  (!%p789_p2), %s925_s1, 256, %s180_s3, [#allocation9], %s692_s18, %s692_s18, %s693_s20  }
  0x46   : > { %p935_p0 = scmp.ne.s32.totalorder %s934_s27, 0 }
  0x47   : > { %s193_s4 = sand.u32 (!%p935_p0), 1, %s677_s13   ;;  %p936_p5 = scmp.ne.s32.totalorder (!%p935_p0), %s930_s21, 0 }
  0x48   : > { %191 = sbr.rel (%p935_p0) target bundleno = 111 (0x6f), region = 28  ;;  %s417_s5 = sshll.u32 (!%p935_p0), %s193_s4, 4 }
  0x49   : > { %s194_s6 = scalar_lea.sflag (!%p935_p0), [#allocation6], %s193_s4  ;;  %s197_s7 = scalar_lea.vmem (!%p935_p0), [#allocation5], %s417_s5 }
  0x4f   : > { %647 = dma.done.wait (%p936_p5), %s194_s6, 256  }
  0x50   : > { %649 = vsyncadd (%p936_p5), %s194_s6, 4294967040  ;;  %s203_s29 = scalar_lea.sflag [#allocation9], %s193_s4  ;;  %s206_s8 = scalar_lea.vmem [#allocation8], %s417_s5 }
  0x51   : > { %651 = dma.done.wait (%p936_p5), %s203_s29, 256  }
  0x52   : > { %653 = vsyncadd (%p936_p5), %s203_s29, 4294967040  ;;  %s229_s18 = sand.u32 1, %s665_s10   ;;  %v248_v0 = vlaneseq  ;;  %s419_s20 = sshll.u32 %s681_s14, 4  ;;  %v257_v6 = vld [vmem:[%s197_s7] sm:$0xff]  ;;  %v258_v7 = vld [vmem:[%s197_s7 + $0x8] sm:$0xff] }
  0x53   : > { %v252_v1 = vstv %s419_s20  ;;  %s425_s27 = smul.u32 24, %s229_s18  ;;  %v261_v8 = vld [vmem:[%s206_s8] sm:$0xff]  ;;  %v262_v10 = vld [vmem:[%s206_s8 + $0x8] sm:$0xff]  ;;  %s872_s22 = scalar_lea.sflag [#allocation7], %s229_s18 }
  0x54   : > { %v249_v2 = vshrl.u32 %v248_v0, 7  ;;  %s426_s21 = smul.u32 384, %s681_s14  ;;  %p937_p8 = scmp.ne.s32.totalorder %s931_s25, 0 }
  0x55   : > { %s231_s3 = scalar_lea.vmem [#allocation10], %s425_s27  ;;  %s695_s30 = smov [#allocation10]  }
  0x56   : > { %v250_v3 = vadd.s32 8, %v249_v2  ;;  %v253_v4 = vadd.s32 %v252_v1, %v249_v2  ;;  %s302_s28 = sshll.u32 %s231_s3, 4  ;;  %s868_s14 = scalar_lea.hbm %s926_s2, %s426_s21  ;;  %s863_s28 = int_to_ptr.vmem [resolvable:$true] %s302_s28 }
  0x57   : > { %s582_s23 = scalar_lea.vmem %s863_s28, 384  ;;  %s586_s4 = sshll.u32 %s695_s30, 4  ;;  %s587_s4 = int_to_ptr.vmem [resolvable:$false] %s586_s4 }
  0x58   : > { %v254_v5 = vadd.s32 %v252_v1, %v250_v3  ;;  %vm255_vm0 = vcmp.lt.s32.totalorder %v253_v4, 16  ;;  %p583_p2 = scmp.ne.s32.totalorder %s863_s28, %s582_s23  ;;  %s588_s5 = scalar_lea.vmem %s587_s4, 768 }
  0x59   : > { %v259_v9 = vsel %vm255_vm0, %v257_v6, 0.0  ;;  %v263_v11 = vsel %vm255_vm0, %v261_v8, 0.0  ;;  %p589_p11 = scmp.lt.s32.totalorder %s863_s28, %s587_s4  ;;  %p590_p1 = scmp.lt.s32.totalorder %s588_s5, %s582_s23 }
  0x5a   : > { %vm256_vm1 = vcmp.lt.s32.totalorder %v254_v5, 16  ;;  %v266_v14 = vmul.f32 %v263_v11, %v259_v9  ;;  %p584_p9 = pnand %p583_p2, %p937_p8 }
  0x5b   : > { %v260_v12 = vsel %vm256_vm1, %v258_v7, 0.0  ;;  %v264_v13 = vsel %vm256_vm1, %v262_v10, 0.0  ;;  %p591_p3 = por %p590_p1, %p589_p11 }
  0x5c   : > { %v267_v15 = vmul.f32 %v264_v13, %v260_v12  ;;  %v272_v16 = vadd.f32 %v260_v12, %v259_v9  ;;  %v276_v17 = vadd.f32 %v264_v13, %v263_v11  ;;  %p585_p10 = pneg %p584_p9 }
  0x5e   : > { %v268_v18 = vadd.f32 %v267_v15, %v266_v14  ;;  %286 = vst [vmem:[%s231_s3 + $0x8] sm:$0xff] %v272_v16  ;;  %287 = vst [vmem:[%s231_s3 + $0x10] sm:$0xff] %v276_v17  ;;  %p592_p7 = pnand %p591_p3, %p585_p10 }
  0x60   : > { %285 = vst [vmem:[%s231_s3] sm:$0xff] %v268_v18 }
  0x61   : > { %595 = shalt.err (!%p592_p7)
}
  0x62   : > { %s596_s6 = scalar_lea.hbm %s868_s14, 384  ;;  %s600_s8 = scalar_lea.hbm %s926_s2, 768 }
  0x63   : > { %p597_p13 = scmp.ne.s32.totalorder %s868_s14, %s596_s6  ;;  %p601_p12 = scmp.lt.u32.totalorder %s868_s14, %s926_s2 }
  0x64   : > { %p602_p0 = scmp.lt.u32.totalorder %s600_s8, %s596_s6  ;;  %p604_p2 = scmp.lt.u32.totalorder %s596_s6, %s868_s14 }
  0x65   : > { %p598_p4 = pnand %p597_p13, %p937_p8 }
  0x66   : > { %p603_p5 = por %p602_p0, %p601_p12 }
  0x67   : > { %p599_p6 = pneg %p598_p4 }
  0x68   : > { %p605_p9 = por %p604_p2, %p603_p5 }
  0x6a   : > { %p606_p10 = pnand %p605_p9, %p599_p6 }
  0x6c   : > { %609 = shalt.err (!%p606_p10)
}
  0x6d   : > { %s696_s27 = smov 128   ;;  %s697_s21 = smov 8  }
  0x6e   : > { %431 = dma.vmem_to_hbm [thread:$0]  (%p937_p8), %s863_s28, 384, %s868_s14, %s872_s22, %s696_s27, %s696_s27, %s697_s21  }
  0x6f PF: > { %s317_s3 = sand.u32 1, %s661_s9   ;;  %p938_p11 = scmp.ne.s32.totalorder %s932_s26, 0 }
  0x70   : > { %p939_p1 = scmp.ge.s32.totalorder %s689_s16, 2  ;;  %s318_s12 = scalar_lea.sflag [#allocation7], %s317_s3 }
  0x72   : > { %p441_p3 = pnand %p939_p1, %p938_p11 }
  0x74   : > { %655 = dma.done.wait (!%p441_p3), %s318_s12, 384  }
  0x75   : > { %657 = vsyncadd (!%p441_p3), %s318_s12, 4294966912  ;;  %s21_s16 = sadd.s32 1, %s689_s16   ;;  %s940_s9 = smov %s665_s10 }
  0x76   : > { %p18_p7 = scmp.ge.s32.totalorder %s21_s16, 4   ;;  %s941_s10 = smov %s669_s11 }
  0x77   : > { %s942_s11 = smov %s771_s24  ;;  %s943_s12 = smov %s677_s13 }
  0x78   : > { %s914_s13 = smov 0   ;;  %s944_s14 = smov %s685_s15 }
  0x79   : > { %s945_s15 = smov %s947_s19  ;;  %20 = sbr.rel (!%p18_p7) target bundleno = 9 (0x9), region = 94 }
  0x80   :  { %323 = vsyncpa [#allocation6], 1 }
  0x81   :  { %325 = vsyncpa [#allocation6 + $0x1], 1 }
  0x82   :  { %326 = vsyncpa [#allocation9], 1 }
  0x83   :  { %328 = vsyncpa [#allocation9 + $0x1], 1 }
  0x84   :  { %329 = vsyncpa [#allocation7], 1 }
  0x85   :  { %331 = vsyncpa [#allocation7 + $0x1], 1 }

</bundles_post_ra>
